<compile_context>
chip_gen: v6e
topology: v6e:2x2x1
jax: 0.10.0
libtpu: 0.0.40
codegen_flags: <defaults>
</compile_context>

<pallas_src>
import jax
import jax.numpy as jnp
from jax import lax
from jax.experimental import pallas as pl
from jax.experimental.pallas import tpu as pltpu


def switchnorm2d_forward(x_nchw, params):
    """Pallas implementation of SwitchNorm2d.forward (eval). x: (N, C, H, W)."""
    N, C, H, W = x_nchw.shape
    HW = H * W
    HWp = max(128, ((HW + 127) // 128) * 128)      # lane-dense last dim

    x_flat = x_nchw.reshape(N, C, HW)
    if HWp != HW:
        # Zero-pad: contributes 0 to sum and sumsq, so true-HW divisors stay exact.
        x_flat = jnp.pad(x_flat, ((0, 0), (0, 0), (0, HWp - HW)))

    # ---- parameter-only glue (wrapper side, no data dependence) ----
    mw = jax.nn.softmax(params["mean_weight"].astype(jnp.float32))
    vw = jax.nn.softmax(params["var_weight"].astype(jnp.float32))
    eps = jnp.float32(params["eps"])

    gamma = params["weight"].reshape(C).astype(jnp.float32)
    beta = params["bias"].reshape(C).astype(jnp.float32)
    rmean = params["running_mean"].reshape(C).astype(jnp.float32)
    rvar = params["running_var"].reshape(C).astype(jnp.float32)

    # Pack + prefold: [gamma, beta, mw2*rmean, vw2*rvar + eps]  -> single (C,4) DMA.
    pp = jnp.stack([gamma, beta, mw[2] * rmean, vw[2] * rvar + eps], axis=-1)
    # Remaining mixing scalars ride in SMEM.
    sw = jnp.stack([mw[0], mw[1], vw[0], vw[1]]).astype(jnp.float32)

    # ---- block / grid sizing ----
    in_itemsize = x_flat.dtype.itemsize
    out_itemsize = x_nchw.dtype.itemsize
    block_bytes = C * HWp * in_itemsize            # one batch element's x tile
    total_bytes = N * block_bytes

    if total_bytes <= (1 << 20):
        nb = N                                     # tiny: one step, avoid per-step overhead
    else:
        target = 2 << 20                           # ~2 MiB x block per grid step
        nb = max(1, min(N, target // block_bytes))
        vmem_budget = 24 << 20                     # conservative: fits v7x 64 MiB physical
        nb = max(1, min(nb, vmem_budget // (4 * block_bytes)))
        if nb >= N and N >= 2:
            nb = (N + 1) // 2                      # keep >=2 steps (v7x dual TC)
    while N % nb:                                  # largest nb that divides N evenly
        nb -= 1

    grid = (N // nb,)

    # Scoped-VMEM request: in+out double-buffered + f32 temporaries headroom.
    needed = 2 * nb * C * HWp * (in_itemsize + out_itemsize) + 4 * nb * C * HWp * 4
    vmem_limit = int(min(max(needed + (2 << 20), 16 << 20), 64 << 20))

    inv_hw = 1.0 / HW
    inv_hwm1 = 1.0 / max(HW - 1, 1)                # guard 1x1 feature maps

    def kernel(sw_ref, x_ref, pp_ref, o_ref):
        # x_ref: (nb, C, HWp) -- channels on sublanes, spatial on lanes.
        xf = x_ref[...].astype(jnp.float32)

        # One-pass stats: sum and sumsq together (single traversal of the tile).
        s1 = jnp.sum(xf, axis=-1, keepdims=True)                   # (nb, C, 1)
        s2 = jnp.sum(xf * xf, axis=-1, keepdims=True)              # (nb, C, 1)
        mean_in = s1 * inv_hw
        var_in = (s2 - mean_in * s1) * inv_hwm1                    # unbiased (torch default)

        # Layer stats: channel-average of the instance stats (sublane reduce).
        mean_ln = jnp.mean(mean_in, axis=1, keepdims=True)         # (nb, 1, 1)
        temp = var_in + mean_in * mean_in
        var_ln = jnp.mean(temp, axis=1, keepdims=True) - mean_ln * mean_ln

        # Packed per-channel params: [gamma, beta, mw2*rmean, vw2*rvar + eps].
        p = pp_ref[...]
        gamma_c, beta_c = p[:, 0:1], p[:, 1:2]                     # (C, 1)
        mbn_term, vbn_term = p[:, 2:3], p[:, 3:4]                  # prefolded bn terms

        mw0, mw1 = sw_ref[0], sw_ref[1]
        vw0, vw1 = sw_ref[2], sw_ref[3]

        mean = mw0 * mean_in + mw1 * mean_ln + mbn_term            # (nb, C, 1)
        var = vw0 * var_in + vw1 * var_ln + vbn_term               # eps already included

        inv_std = lax.rsqrt(var)                                   # EUP
        scale = inv_std * gamma_c                                  # fold affine into
        shift = beta_c - mean * scale                              # one mul + one add
        o_ref[...] = (xf * scale + shift).astype(o_ref.dtype)

    tile = pl.BlockSpec((nb, C, HWp), lambda b: (b, 0, 0))

    out_flat = pl.pallas_call(
        kernel,
        out_shape=jax.ShapeDtypeStruct((N, C, HWp), x_nchw.dtype),
        grid=grid,
        in_specs=[pl.BlockSpec(memory_space=pltpu.MemorySpace.SMEM),   # sw scalars
                  tile,                                                # x
                  pl.BlockSpec((C, 4), lambda b: (0, 0))],             # packed params
        out_specs=tile,
        compiler_params=pltpu.CompilerParams(
            dimension_semantics=("parallel",),
            vmem_limit_bytes=vmem_limit),
    )(sw, x_flat, pp)

    return out_flat[:, :, :HW].reshape(N, C, H, W)


def reference_forward(x, params):
    """Pure-JAX mirror of the PyTorch eval forward (NCHW), for verification."""
    N, C, H, W = x.shape
    eps = params["eps"]
    xf = x.reshape(N, C, -1).astype(jnp.float32)                      # (N, C, HW)

    mean_in = jnp.mean(xf, axis=-1, keepdims=True)
    var_in = jnp.var(xf, axis=-1, keepdims=True, ddof=1)              # unbiased
    mean_ln = jnp.mean(mean_in, axis=1, keepdims=True)
    temp = var_in + mean_in ** 2
    var_ln = jnp.mean(temp, axis=1, keepdims=True) - mean_ln ** 2

    mean_bn = params["running_mean"].astype(jnp.float32)              # (1, C, 1)
    var_bn = params["running_var"].astype(jnp.float32)

    mw = jax.nn.softmax(params["mean_weight"].astype(jnp.float32))
    vw = jax.nn.softmax(params["var_weight"].astype(jnp.float32))

    mean = mw[0] * mean_in + mw[1] * mean_ln + mw[2] * mean_bn
    var = vw[0] * var_in + vw[1] * var_ln + vw[2] * var_bn

    xn = (xf - mean) / jnp.sqrt(var + eps)
    xn = xn.reshape(N, C, H, W)
    out = xn * params["weight"].astype(jnp.float32) + params["bias"].astype(jnp.float32)
    return out.astype(x.dtype)


def _make_params(key, C):
    keys = jax.random.split(key, 6)
    return dict(
        weight=1.0 + 0.1 * jax.random.normal(keys[0], (1, C, 1, 1), jnp.float32),
        bias=0.1 * jax.random.normal(keys[1], (1, C, 1, 1), jnp.float32),
        mean_weight=jax.random.normal(keys[2], (3,), jnp.float32),
        var_weight=jax.random.normal(keys[3], (3,), jnp.float32),
        running_mean=0.1 * jax.random.normal(keys[4], (1, C, 1), jnp.float32),
        running_var=0.5 + jnp.abs(jax.random.normal(keys[5], (1, C, 1), jnp.float32)),
        eps=1e-5,
    )


if __name__ == "__main__":
    key = jax.random.PRNGKey(0)

    # --- Test 1: f32, H*W already a multiple of 128 (lane-dense as-is). ---
    k1, k2, k3, k4 = jax.random.split(key, 4)
    N, C, H, W = 2, 64, 16, 16
    x = jax.random.normal(k1, (N, C, H, W), jnp.float32)
    params = _make_params(k2, C)

    out = jax.block_until_ready(switchnorm2d_forward(x, params))
    ref = reference_forward(x, params)
    assert out.shape == x.shape and out.dtype == x.dtype
    err1 = float(jnp.max(jnp.abs(out.astype(jnp.float32) - ref.astype(jnp.float32))))
    assert err1 < 2e-3, f"f32 max err {err1}"

    # --- Test 2: bf16 I/O, non-128-multiple spatial (14x14 -> padded to 256). ---
    N2, C2, H2, W2 = 2, 32, 14, 14
    x2 = jax.random.normal(k3, (N2, C2, H2, W2), jnp.float32).astype(jnp.bfloat16)
    params2 = _make_params(k4, C2)

    out2 = jax.block_until_ready(switchnorm2d_forward(x2, params2))
    ref2 = reference_forward(x2, params2)
    assert out2.shape == x2.shape and out2.dtype == x2.dtype
    err2 = float(jnp.max(jnp.abs(out2.astype(jnp.float32) - ref2.astype(jnp.float32))))
    assert err2 < 3e-2, f"bf16 max err {err2}"

    print("KERNEL_OK")
</pallas_src>

<mosaic_0001>
module attributes {stable_mosaic.version = 11 : i64} {
  func.func @kernel(%arg0: i32, %arg1: memref<4xf32, #tpu.memory_space<smem>>, %arg2: memref<2x64x256xf32, #tpu.memory_space<vmem>>, %arg3: memref<64x4xf32, #tpu.memory_space<vmem>>, %arg4: memref<2x64x256xf32, #tpu.memory_space<vmem>>) attributes {dimension_semantics = [#tpu.dimension_semantics<parallel>], iteration_bounds = array<i64: 1>, scalar_prefetch = 0 : i64, scratch_operands = 0 : i64, tpu.core_type = #tpu.core_type<tc>, window_params = [{transform_indices = @transform_0, window_bounds = array<i64: 4>}, {transform_indices = @transform_1, window_bounds = array<i64: 2, 64, 256>}, {pipeline_mode = #tpu.pipeline_mode<synchronous>, transform_indices = @transform_2, window_bounds = array<i64: 64, 4>}, {transform_indices = @transform_3, window_bounds = array<i64: 2, 64, 256>}]} {
    %c0 = arith.constant 0 : index
    %c0_0 = arith.constant 0 : index
    %c0_1 = arith.constant 0 : index
    %0 = vector.load %arg2[%c0, %c0_0, %c0_1] : memref<2x64x256xf32, #tpu.memory_space<vmem>>, vector<2x64x256xf32>
    %cst = arith.constant dense<0.000000e+00> : vector<2x64xf32>
    %1 = vector.multi_reduction <add>, %0, %cst [2] : vector<2x64x256xf32> to vector<2x64xf32>
    %2 = vector.shape_cast %1 : vector<2x64xf32> to vector<2x64x1xf32>
    %3 = arith.mulf %0, %0 : vector<2x64x256xf32>
    %cst_2 = arith.constant dense<0.000000e+00> : vector<2x64xf32>
    %4 = vector.multi_reduction <add>, %3, %cst_2 [2] : vector<2x64x256xf32> to vector<2x64xf32>
    %5 = vector.shape_cast %4 : vector<2x64xf32> to vector<2x64x1xf32>
    %cst_3 = arith.constant 3.906250e-03 : f32
    %6 = vector.broadcast %cst_3 : f32 to vector<2x64x1xf32>
    %7 = arith.mulf %2, %6 : vector<2x64x1xf32>
    %8 = arith.mulf %7, %2 : vector<2x64x1xf32>
    %9 = arith.subf %5, %8 : vector<2x64x1xf32>
    %cst_4 = arith.constant 0.00392156886 : f32
    %10 = vector.broadcast %cst_4 : f32 to vector<2x64x1xf32>
    %11 = arith.mulf %9, %10 : vector<2x64x1xf32>
    %cst_5 = arith.constant dense<0.000000e+00> : vector<2x1xf32>
    %12 = vector.multi_reduction <add>, %7, %cst_5 [1] : vector<2x64x1xf32> to vector<2x1xf32>
    %13 = vector.shape_cast %12 : vector<2x1xf32> to vector<2x1x1xf32>
    %cst_6 = arith.constant 6.400000e+01 : f32
    %14 = vector.broadcast %cst_6 : f32 to vector<2x1x1xf32>
    %15 = arith.divf %13, %14 : vector<2x1x1xf32>
    %16 = arith.mulf %7, %7 : vector<2x64x1xf32>
    %17 = arith.addf %11, %16 : vector<2x64x1xf32>
    %cst_7 = arith.constant dense<0.000000e+00> : vector<2x1xf32>
    %18 = vector.multi_reduction <add>, %17, %cst_7 [1] : vector<2x64x1xf32> to vector<2x1xf32>
    %19 = vector.shape_cast %18 : vector<2x1xf32> to vector<2x1x1xf32>
    %cst_8 = arith.constant 6.400000e+01 : f32
    %20 = vector.broadcast %cst_8 : f32 to vector<2x1x1xf32>
    %21 = arith.divf %19, %20 : vector<2x1x1xf32>
    %22 = arith.mulf %15, %15 : vector<2x1x1xf32>
    %23 = arith.subf %21, %22 : vector<2x1x1xf32>
    %c0_9 = arith.constant 0 : index
    %c0_10 = arith.constant 0 : index
    %24 = vector.load %arg3[%c0_9, %c0_10] : memref<64x4xf32, #tpu.memory_space<vmem>>, vector<64x4xf32>
    %25 = vector.extract_strided_slice %24 {offsets = [0, 0], sizes = [64, 1], strides = [1, 1]} : vector<64x4xf32> to vector<64x1xf32>
    %26 = vector.extract_strided_slice %24 {offsets = [0, 1], sizes = [64, 1], strides = [1, 1]} : vector<64x4xf32> to vector<64x1xf32>
    %27 = vector.extract_strided_slice %24 {offsets = [0, 2], sizes = [64, 1], strides = [1, 1]} : vector<64x4xf32> to vector<64x1xf32>
    %28 = vector.extract_strided_slice %24 {offsets = [0, 3], sizes = [64, 1], strides = [1, 1]} : vector<64x4xf32> to vector<64x1xf32>
    %c0_11 = arith.constant 0 : index
    %29 = memref.load %arg1[%c0_11] : memref<4xf32, #tpu.memory_space<smem>>
    %c1 = arith.constant 1 : index
    %30 = memref.load %arg1[%c1] : memref<4xf32, #tpu.memory_space<smem>>
    %c2 = arith.constant 2 : index
    %31 = memref.load %arg1[%c2] : memref<4xf32, #tpu.memory_space<smem>>
    %c3 = arith.constant 3 : index
    %32 = memref.load %arg1[%c3] : memref<4xf32, #tpu.memory_space<smem>>
    %33 = vector.broadcast %29 : f32 to vector<2x64x1xf32>
    %34 = arith.mulf %33, %7 : vector<2x64x1xf32>
    %35 = vector.broadcast %30 : f32 to vector<2x1x1xf32>
    %36 = arith.mulf %35, %15 : vector<2x1x1xf32>
    %37 = vector.broadcast %36 : vector<2x1x1xf32> to vector<2x64x1xf32>
    %38 = arith.addf %34, %37 : vector<2x64x1xf32>
    %39 = vector.shape_cast %27 : vector<64x1xf32> to vector<1x64x1xf32>
    %40 = vector.broadcast %39 : vector<1x64x1xf32> to vector<2x64x1xf32>
    %41 = arith.addf %38, %40 : vector<2x64x1xf32>
    %42 = vector.broadcast %31 : f32 to vector<2x64x1xf32>
    %43 = arith.mulf %42, %11 : vector<2x64x1xf32>
    %44 = vector.broadcast %32 : f32 to vector<2x1x1xf32>
    %45 = arith.mulf %44, %23 : vector<2x1x1xf32>
    %46 = vector.broadcast %45 : vector<2x1x1xf32> to vector<2x64x1xf32>
    %47 = arith.addf %43, %46 : vector<2x64x1xf32>
    %48 = vector.shape_cast %28 : vector<64x1xf32> to vector<1x64x1xf32>
    %49 = vector.broadcast %48 : vector<1x64x1xf32> to vector<2x64x1xf32>
    %50 = arith.addf %47, %49 : vector<2x64x1xf32>
    %51 = math.rsqrt %50 : vector<2x64x1xf32>
    %52 = vector.shape_cast %25 : vector<64x1xf32> to vector<1x64x1xf32>
    %53 = vector.broadcast %52 : vector<1x64x1xf32> to vector<2x64x1xf32>
    %54 = arith.mulf %51, %53 : vector<2x64x1xf32>
    %55 = arith.mulf %41, %54 : vector<2x64x1xf32>
    %56 = vector.shape_cast %26 : vector<64x1xf32> to vector<1x64x1xf32>
    %57 = vector.broadcast %56 : vector<1x64x1xf32> to vector<2x64x1xf32>
    %58 = arith.subf %57, %55 : vector<2x64x1xf32>
    %59 = vector.broadcast %54 : vector<2x64x1xf32> to vector<2x64x256xf32>
    %60 = arith.mulf %0, %59 : vector<2x64x256xf32>
    %61 = vector.broadcast %58 : vector<2x64x1xf32> to vector<2x64x256xf32>
    %62 = arith.addf %60, %61 : vector<2x64x256xf32>
    %c0_12 = arith.constant 0 : index
    %c0_13 = arith.constant 0 : index
    %c0_14 = arith.constant 0 : index
    %63 = vector.load %arg4[%c0_12, %c0_13, %c0_14] : memref<2x64x256xf32, #tpu.memory_space<vmem>>, vector<2x64x256xf32>
    tpu.vector_store %arg4[%c0_12, %c0_13, %c0_14], %62 {strides = array<i32>} : memref<2x64x256xf32, #tpu.memory_space<vmem>>, vector<2x64x256xf32>,
    return
  }
  func.func @transform_0(%arg0: i32) -> i32 {
    %c0_i32 = arith.constant 0 : i32
    %c0_i32_0 = arith.constant 0 : i32
    return %c0_i32 : i32
  }
  func.func @transform_1(%arg0: i32) -> (i32, i32, i32) {
    %c0_i32 = arith.constant 0 : i32
    %c0_i32_0 = arith.constant 0 : i32
    %c0_i32_1 = arith.constant 0 : i32
    return %arg0, %c0_i32, %c0_i32_0 : i32, i32, i32
  }
  func.func @transform_2(%arg0: i32) -> (i32, i32) {
    %c0_i32 = arith.constant 0 : i32
    %c0_i32_0 = arith.constant 0 : i32
    %c0_i32_1 = arith.constant 0 : i32
    return %c0_i32, %c0_i32_0 : i32, i32
  }
  func.func @transform_3(%arg0: i32) -> (i32, i32, i32) {
    %c0_i32 = arith.constant 0 : i32
    %c0_i32_0 = arith.constant 0 : i32
    %c0_i32_1 = arith.constant 0 : i32
    return %arg0, %c0_i32, %c0_i32_0 : i32, i32, i32
  }
}

</mosaic_0001>

<bundles_post_ra>
// kernel: tpu_custom_call.1
= control target key start
LH: loop header
LB: loop body
LE: loop exit
PB: predicated region body
PF: predicated region fallthrough
CT: control target
= control target key end

     0   :  { %8 = vsyncpa [#allocation5], 0  ;;  %s1676_s0 = inlined_call_operand.vmem [shape: f32[4], index: 0, kind: input, shape index: {}]   ;;  %s1677_s1 = inlined_call_operand.hbm [shape: f32[2,64,256], index: 1, kind: input, shape index: {}]   ;;  %s1678_s2 = inlined_call_operand.vmem [shape: f32[64,4], index: 2, kind: input, shape index: {}]   ;;  %s1679_s3 = inlined_call_operand.hbm [shape: f32[2,64,256], index: 3, kind: output, shape index: {}]  }
   0x1   :  { %9 = vsyncpa [#allocation3], 0 }
   0x2   :  { %10 = vsyncpa [#allocation4], 0  ;;  %s17_s14 = sshll.u32 %s1676_s0, 4  ;;  %s18_s14 = int_to_ptr.vmem [resolvable:$true] %s17_s14 }
   0x3   :  { %s1037_s15 = scalar_lea.vmem %s18_s14, 16  ;;  %p1042_p1 = scmp.lt.s32.totalorder %s18_s14, %s18_s14 }
   0x4   :  { %p1038_p0 = scmp.ne.s32.totalorder %s18_s14, %s1037_s15  ;;  %p1043_p2 = scmp.lt.s32.totalorder %s1037_s15, %s1037_s15 }
   0x6   :  { %p1044_p3 = por %p1043_p2, %p1042_p1 }
   0x8   :  { %p1045_p4 = pnand %p1044_p3, %p1038_p0 }
   0xa   :  { %1048 = shalt.err (!%p1045_p4)
}
   0xb   :  { %s1095_s16 = smov [#allocation2]   ;;  %s1096_s17 = smov [#allocation6]  }
   0xc   :  { %20 = dma.vmem_to_smem %s18_s14, 16, %s1095_s16, [#allocation5]  }
   0xd   :  { %s26_s18 = sshll.u32 %s1096_s17, 4  ;;  %s27_s18 = int_to_ptr.vmem [resolvable:$true] %s26_s18 }
   0xe   :  { %s1057_s19 = scalar_lea.vmem %s27_s18, 4096  ;;  %p1062_p6 = scmp.lt.s32.totalorder %s27_s18, %s27_s18 }
   0xf   :  { %p1058_p5 = scmp.ne.s32.totalorder %s27_s18, %s1057_s19  ;;  %p1063_p7 = scmp.lt.s32.totalorder %s1057_s19, %s1057_s19 }
  0x11   :  { %p1064_p8 = por %p1063_p7, %p1062_p6 }
  0x13   :  { %p1065_p9 = pnand %p1064_p8, %p1058_p5 }
  0x15   :  { %1068 = shalt.err (!%p1065_p9)
}
  0x16   :  { %s1097_s0 = smov 256   ;;  %s1098_s20 = smov 16  }
  0x17   :  { %32 = dma.hbm_to_vmem [thread:$0]  %s1677_s1, 4096, %s27_s18, [#allocation3], %s1097_s0, %s1097_s0, %s1098_s20  }
  0x18   :  { %1089 = dma.done.wait [#allocation5], 16  }
  0x19   :  { %1090 = vsyncadd [#allocation5], 4294967280 }
  0x1a   :  { %1091 = dma.done.wait [#allocation3], 4096  }
  0x1b   :  { %1092 = vsyncadd [#allocation3], 4294963200 }
  0x1c   :  { %41 = sfence }
  0x1d   :  { %v58_v0 = vld [vmem:[#allocation6 + $0x80] sm:$0xff]  ;;  %v59_v1 = vld [vmem:[#allocation6 + $0x88] sm:$0xff]  ;;  %v60_v5 = vld [vmem:[#allocation6 + $0x90] sm:$0xff]  ;;  %s1099_s24 = smov 3   ;;  %s1183_s12 = sld [smem:[#allocation2 + $0x1]] }
  0x1e   :  { %v42_v2 = vld [vmem:[#allocation6] sm:$0xff]  ;;  %v98_v3 = vadd.f32 %v59_v1, %v58_v0  ;;  %v43_v4 = vld [vmem:[#allocation6 + $0x8] sm:$0xff]  ;;  %v61_v6 = vld [vmem:[#allocation6 + $0x98] sm:$0xff]  ;;  %v140_v29 = vmul.f32 %v60_v5, %v60_v5  ;;  %v138_v32 = vmul.f32 %v58_v0, %v58_v0  ;;  %v139_v33 = vmul.f32 %v59_v1, %v59_v1  ;;  %s958_s13 = sld [smem:[#allocation2 + $0x2]]  ;;  %s1101_s15 = smov 127  }
  0x1f   :  { %v74_v7 = vadd.f32 %v43_v4, %v42_v2  ;;  %v44_v8 = vld [vmem:[#allocation6 + $0x10] sm:$0xff]  ;;  %v45_v9 = vld [vmem:[#allocation6 + $0x18] sm:$0xff]  ;;  %v101_v10 = vadd.f32 %v61_v6, %v60_v5  ;;  %v62_v12 = vld [vmem:[#allocation6 + $0xa0] sm:$0xff]  ;;  %v122_v26 = vmul.f32 %v42_v2, %v42_v2  ;;  %v123_v27 = vmul.f32 %v43_v4, %v43_v4  ;;  %s1395_s14 = sld [smem:[#allocation2 + $0x3]]  ;;  %s1103_s16 = smov [#allocation7]  }
  0x20   :  { %99 = vadd.xlane.f32.xlu1 %v98_v3  ;;  %v77_v11 = vadd.f32 %v45_v9, %v44_v8  ;;  %v63_v13 = vld [vmem:[#allocation6 + $0xa8] sm:$0xff]  ;;  %v46_v14 = vld [vmem:[#allocation6 + $0x20] sm:$0xff]  ;;  %v64_v18 = vld [vmem:[#allocation6 + $0xb0] sm:$0xff]  ;;  %v124_v23 = vmul.f32 %v44_v8, %v44_v8  ;;  %v125_v24 = vmul.f32 %v45_v9, %v45_v9  ;;  %v141_v30 = vmul.f32 %v61_v6, %v61_v6  ;;  %s944_s17 = sshll.u32 %s1103_s16, 4  ;;  %s945_s17 = int_to_ptr.vmem [resolvable:$true] %s944_s17 }
  0x21   :  { %75 = vadd.xlane.f32.xlu0 %v74_v7  ;;  %v47_v15 = vld [vmem:[#allocation6 + $0x28] sm:$0xff]  ;;  %v104_v16 = vadd.f32 %v63_v13, %v62_v12  ;;  %v65_v19 = vld [vmem:[#allocation6 + $0xb8] sm:$0xff]  ;;  %v48_v20 = vld [vmem:[#allocation6 + $0x30] sm:$0xff]  ;;  %v154_v31 = vadd.f32 %v123_v27, %v122_v26  ;;  %v178_v35 = vadd.f32 %v139_v33, %v138_v32  ;;  %v142_v41 = vmul.f32 %v62_v12, %v62_v12  ;;  %s1069_s18 = scalar_lea.vmem %s945_s17, 4096  ;;  %p1074_p11 = scmp.lt.s32.totalorder %s945_s17, %s945_s17 }
  0x22   :  { %v80_v17 = vadd.f32 %v47_v15, %v46_v14  ;;  %v49_v21 = vld [vmem:[#allocation6 + $0x38] sm:$0xff]  ;;  %v107_v22 = vadd.f32 %v65_v19, %v64_v18  ;;  %v157_v28 = vadd.f32 %v125_v24, %v124_v23  ;;  %v181_v34 = vadd.f32 %v141_v30, %v140_v29  ;;  %v66_v36 = vld [vmem:[#allocation6 + $0xc0] sm:$0xff]  ;;  %v67_v37 = vld [vmem:[#allocation6 + $0xc8] sm:$0xff]  ;;  %p1070_p10 = scmp.ne.s32.totalorder %s945_s17, %s1069_s18  ;;  %p1075_p12 = scmp.lt.s32.totalorder %s1069_s18, %s1069_s18 }
  0x23   :  { %v83_v25 = vadd.f32 %v49_v21, %v48_v20  ;;  %v50_v38 = vld [vmem:[#allocation6 + $0x40] sm:$0xff]  ;;  %v51_v39 = vld [vmem:[#allocation6 + $0x48] sm:$0xff]  ;;  %v110_v40 = vadd.f32 %v67_v37, %v66_v36  ;;  %v143_v42 = vmul.f32 %v63_v13, %v63_v13  ;;  %v126_v44 = vmul.f32 %v46_v14, %v46_v14  ;;  %v68_v48 = vld [vmem:[#allocation6 + $0xd0] sm:$0xff] }
  0x24   :  { %102 = vadd.xlane.f32.xlu1 %v101_v10  ;;  %v86_v43 = vadd.f32 %v51_v39, %v50_v38  ;;  %v127_v45 = vmul.f32 %v47_v15, %v47_v15  ;;  %v69_v49 = vld [vmem:[#allocation6 + $0xd8] sm:$0xff]  ;;  %v52_v50 = vld [vmem:[#allocation6 + $0x50] sm:$0xff]  ;;  %v144_v53 = vmul.f32 %v64_v18, %v64_v18  ;;  %v145_v54 = vmul.f32 %v65_v19, %v65_v19  ;;  %v70_v60 = vld [vmem:[#allocation6 + $0xe0] sm:$0xff]  ;;  %p1076_p13 = por %p1075_p12, %p1074_p11 }
  0x25   :  { %78 = vadd.xlane.f32.xlu0 %v77_v11  ;;  %v184_v46 = vadd.f32 %v143_v42, %v142_v41  ;;  %v53_v51 = vld [vmem:[#allocation6 + $0x58] sm:$0xff]  ;;  %v113_v52 = vadd.f32 %v69_v49, %v68_v48  ;;  %v128_v56 = vmul.f32 %v48_v20, %v48_v20  ;;  %v129_v57 = vmul.f32 %v49_v21, %v49_v21  ;;  %v71_v61 = vld [vmem:[#allocation6 + $0xe8] sm:$0xff]  ;;  %v54_v62 = vld [vmem:[#allocation6 + $0x60] sm:$0xff] }
  0x26   :  { %v160_v47 = vadd.f32 %v127_v45, %v126_v44  ;;  %v89_v55 = vadd.f32 %v53_v51, %v52_v50  ;;  %v187_v58 = vadd.f32 %v145_v54, %v144_v53  ;;  %v55_v63 = vld [vmem:[#allocation6 + $0x68] sm:$0xff]  ;;  %v116_v0 = vadd.f32 %v71_v61, %v70_v60  ;;  %v72_v8 = vld [vmem:[#allocation6 + $0xf0] sm:$0xff]  ;;  %v73_v9 = vld [vmem:[#allocation6 + $0xf8] sm:$0xff]  ;;  %p1077_p0 = pnand %p1076_p13, %p1070_p10 }
  0x27   :  { %v163_v59 = vadd.f32 %v129_v57, %v128_v56  ;;  %v146_v1 = vmul.f32 %v66_v36, %v66_v36  ;;  %v147_v2 = vmul.f32 %v67_v37, %v67_v37  ;;  %v92_v3 = vadd.f32 %v55_v63, %v54_v62  ;;  %v56_v10 = vld [vmem:[#allocation6 + $0x70] sm:$0xff]  ;;  %v57_v11 = vld [vmem:[#allocation6 + $0x78] sm:$0xff]  ;;  %v1136_v32 = vld [vmem:[%s1678_s2 + $0x8] sm:$0xff] }
  0x28   :  { %105 = vadd.xlane.f32.xlu1 %v104_v16  ;;  %v130_v4 = vmul.f32 %v50_v38, %v50_v38  ;;  %v131_v5 = vmul.f32 %v51_v39, %v51_v39  ;;  %v119_v12 = vadd.f32 %v73_v9, %v72_v8  ;;  %v148_v13 = vmul.f32 %v68_v48, %v68_v48  ;;  %v1142_v33 = vld [vmem:[%s1678_s2 + $0x10] sm:$0xff]  ;;  %v1159_v36 = vld [vmem:[%s1678_s2 + $0x20] sm:$0xff]  ;;  %v1165_v37 = vld [vmem:[%s1678_s2 + $0x28] sm:$0xff] }
  0x29   :  { %81 = vadd.xlane.f32.xlu0 %v80_v17  ;;  %v190_v6 = vadd.f32 %v147_v2, %v146_v1  ;;  %v149_v14 = vmul.f32 %v69_v49, %v69_v49  ;;  %v95_v15 = vadd.f32 %v57_v11, %v56_v10  ;;  %v132_v16 = vmul.f32 %v52_v50, %v52_v50  ;;  %v1171_v38 = vld [vmem:[%s1678_s2 + $0x30] sm:$0xff]  ;;  %v1177_v39 = vld [vmem:[%s1678_s2 + $0x38] sm:$0xff] }
  0x2a   :  { %v166_v7 = vadd.f32 %v131_v5, %v130_v4  ;;  %v133_v17 = vmul.f32 %v53_v51, %v53_v51  ;;  %v150_v19 = vmul.f32 %v70_v60, %v70_v60  ;;  %v151_v20 = vmul.f32 %v71_v61, %v71_v61  ;;  %1683 = vst [vmem:[#allocation11_spill] sm:$0xff] %v1171_v38 }
  0x2b   :  { %v193_v18 = vadd.f32 %v149_v14, %v148_v13  ;;  %v135_v23 = vmul.f32 %v55_v63, %v55_v63  ;;  %v153_v26 = vmul.f32 %v73_v9, %v73_v9  ;;  %v137_v29 = vmul.f32 %v57_v11, %v57_v11 }
  0x2c   :  { %108 = vadd.xlane.f32.xlu1 %v107_v22  ;;  %v169_v21 = vadd.f32 %v133_v17, %v132_v16  ;;  %v134_v22 = vmul.f32 %v54_v62, %v54_v62  ;;  %v196_v24 = vadd.f32 %v151_v20, %v150_v19  ;;  %v1100_v49 = vmov 3  }
  0x2d   :  { %84 = vadd.xlane.f32.xlu0 %v83_v25  ;;  %v152_v25 = vmul.f32 %v72_v8, %v72_v8  ;;  %970 = vset.pattern.permute.xlu1 %v1100_v49 }
  0x2e   :  { %v172_v27 = vadd.f32 %v135_v23, %v134_v22  ;;  %969 = vset.pattern.permute.xlu0 %v1100_v49 }
  0x2f   :  { %v199_v30 = vadd.f32 %v153_v26, %v152_v25 }
  0x30   :  { %158 = vadd.xlane.f32.xlu1 %v157_v28  ;;  %v136_v28 = vmul.f32 %v56_v10, %v56_v10 }
  0x31   :  { %155 = vadd.xlane.f32.xlu0 %v154_v31 }
  0x32   :  { %v175_v31 = vadd.f32 %v137_v29, %v136_v28 }
  0x34   :  { %182 = vadd.xlane.f32.xlu1 %v181_v34  ;;  %v1147_v34 = vld [vmem:[%s1678_s2] sm:$0xff] }
  0x35   :  { %179 = vadd.xlane.f32.xlu0 %v178_v35  ;;  %v1153_v35 = vld [vmem:[%s1678_s2 + $0x18] sm:$0xff]  ;;  %s367_s2 = sld [smem:[#allocation2]] }
  0x38   :  { %111 = vadd.xlane.f32.xlu1 %v110_v40 }
  0x39   :  { %87 = vadd.xlane.f32.xlu0 %v86_v43 }
  0x3b   :  { %v1198_v5 = vstv %s367_s2 }
  0x3c   :  { %185 = vadd.xlane.f32.xlu1 %v184_v46 }
  0x3d   :  { %161 = vadd.xlane.f32.xlu0 %v160_v47 }
  0x40   :  { %114 = vadd.xlane.f32.xlu1 %v113_v52 }
  0x41   :  { %90 = vadd.xlane.f32.xlu0 %v89_v55 }
  0x44   :  { %188 = vadd.xlane.f32.xlu1 %v187_v58 }
  0x45   :  { %164 = vadd.xlane.f32.xlu0 %v163_v59 }
  0x48   :  { %117 = vadd.xlane.f32.xlu1 %v116_v0 }
  0x49   :  { %93 = vadd.xlane.f32.xlu0 %v92_v3 }
  0x4c   :  { %191 = vadd.xlane.f32.xlu1 %v190_v6 }
  0x4d   :  { %167 = vadd.xlane.f32.xlu0 %v166_v7 }
  0x50   :  { %120 = vadd.xlane.f32.xlu1 %v119_v12 }
  0x51   :  { %96 = vadd.xlane.f32.xlu0 %v95_v15 }
  0x54   :  { %194 = vadd.xlane.f32.xlu1 %v193_v18 }
  0x55   :  { %170 = vadd.xlane.f32.xlu0 %v169_v21 }
  0x58   :  { %197 = vadd.xlane.f32.xlu1 %v196_v24 }
  0x59   :  { %173 = vadd.xlane.f32.xlu0 %v172_v27 }
  0x5c   :  { %200 = vadd.xlane.f32.xlu1 %v199_v30 }
  0x5d   :  { %176 = vadd.xlane.f32.xlu0 %v175_v31 }
  0x6d   :  { %501 = vrot.lane.b32.xlu1 %v1136_v32, %s1099_s24 }
  0x71   :  { %503 = vrot.lane.b32.xlu1 %v1142_v33, %s1099_s24 }
  0x73   :  { %499 = vrot.lane.b32.xlu0 %v1147_v34, %s1099_s24 }
  0x75   :  { %505 = vrot.lane.b32.xlu1 %v1153_v35, %s1099_s24 }
  0x77   :  { %507 = vrot.lane.b32.xlu0 %v1159_v36, %s1099_s24 }
  0x79   :  { %509 = vrot.lane.b32.xlu1 %v1165_v37, %s1099_s24 }
  0x7b   :  { %511 = vrot.lane.b32.xlu0 %v1171_v38, %s1099_s24 }
  0x7d   :  { %513 = vrot.lane.b32.xlu1 %v1177_v39, %s1099_s24 }
  0xa9   :  { %v100_v40 = vpop.xlane.xlu1 %99 }
  0xaa   :  { %v76_v41 = vpop.xlane.xlu0 %75  ;;  %v210_v55 = vmul.f32 0.00390625, %v100_v40 }
  0xab   :  { %v202_v56 = vmul.f32 0.00390625, %v76_v41 }
  0xac   :  { %v226_v62 = vmul.f32 %v210_v55, %v100_v40  ;;  %v303_v11 = vmul.f32 %v210_v55, %v210_v55  ;;  %v1205_v13 = vmul.f32 %v1198_v5, %v210_v55 }
  0xad   :  { %v103_v42 = vpop.xlane.xlu1 %102  ;;  %v218_v61 = vmul.f32 %v202_v56, %v76_v41  ;;  %v295_v10 = vmul.f32 %v202_v56, %v202_v56  ;;  %v1216_v23 = vmul.f32 %v1198_v5, %v202_v56 }
  0xae   :  { %v79_v43 = vpop.xlane.xlu0 %78  ;;  %v1185_v57 = vmul.f32 0.00390625, %v103_v42 }
  0xaf   :  { %v1187_v58 = vmul.f32 0.00390625, %v79_v43 }
  0xb0   :  { %v279_v63 = vadd.f32 %v1185_v57, %v210_v55  ;;  %v227_v2 = vmul.f32 %v1185_v57, %v103_v42  ;;  %v304_v21 = vmul.f32 %v1185_v57, %v1185_v57 }
  0xb1   :  { %v106_v44 = vpop.xlane.xlu1 %105  ;;  %v219_v0 = vmul.f32 %v1187_v58, %v79_v43  ;;  %v266_v19 = vadd.f32 %v1187_v58, %v202_v56  ;;  %v296_v26 = vmul.f32 %v1187_v58, %v1187_v58 }
  0xb2   :  { %v82_v45 = vpop.xlane.xlu0 %81  ;;  %v1191_v1 = vmul.f32 0.00390625, %v106_v44 }
  0xb3   :  { %v1200_v6 = vmul.f32 0.00390625, %v82_v45 }
  0xb4   :  { %v228_v12 = vmul.f32 %v1191_v1, %v106_v44  ;;  %v280_v14 = vadd.f32 %v279_v63, %v1191_v1  ;;  %v305_v29 = vmul.f32 %v1191_v1, %v1191_v1 }
  0xb5   :  { %v109_v46 = vpop.xlane.xlu1 %108  ;;  %v220_v24 = vmul.f32 %v1200_v6, %v82_v45  ;;  %v267_v28 = vadd.f32 %v266_v19, %v1200_v6  ;;  %v297_v31 = vmul.f32 %v1200_v6, %v1200_v6 }
  0xb6   :  { %v85_v47 = vpop.xlane.xlu0 %84  ;;  %v1208_v15 = vmul.f32 0.00390625, %v109_v46 }
  0xb7   :  { %v1211_v20 = vmul.f32 0.00390625, %v85_v47 }
  0xb8   :  { %v281_v40 = vadd.f32 %v280_v14, %v1208_v15  ;;  %v229_v49 = vmul.f32 %v1208_v15, %v109_v46 }
  0xb9   :  { %v159_v48 = vpop.xlane.xlu1 %158  ;;  %v221_v45 = vmul.f32 %v1211_v20, %v85_v47 }
  0xba   :  { %v156_v50 = vpop.xlane.xlu0 %155  ;;  %v235_v7 = vsub.f32 %v159_v48, %v219_v0 }
  0xbb   :  { %v234_v8 = vsub.f32 %v156_v50, %v218_v61  ;;  %v306_v50 = vmul.f32 %v1208_v15, %v1208_v15 }
  0xbc   :  { %v1219_v25 = vmul.f32 0.003921569, %v235_v7 }
  0xbd   :  { %v183_v51 = vpop.xlane.xlu1 %182  ;;  %v1223_v27 = vmul.f32 0.003921569, %v234_v8 }
  0xbe   :  { %v180_v52 = vpop.xlane.xlu0 %179  ;;  %v243_v16 = vsub.f32 %v183_v51, %v227_v2  ;;  %v312_v55 = vadd.f32 %v296_v26, %v1219_v25 }
  0xbf   :  { %v242_v17 = vsub.f32 %v180_v52, %v226_v62  ;;  %v268_v52 = vadd.f32 %v267_v28, %v1211_v20  ;;  %v311_v56 = vadd.f32 %v295_v10, %v1223_v27 }
  0xc0   :  { %v1231_v41 = vmul.f32 0.003921569, %v243_v16 }
  0xc1   :  { %v112_v53 = vpop.xlane.xlu1 %111  ;;  %v1233_v42 = vmul.f32 0.003921569, %v242_v17  ;;  %v327_v16 = vadd.f32 %v312_v55, %v311_v56 }
  0xc2   :  { %v1181_v54 = vpop.xlane.xlu0 %87  ;;  %v1236_v48 = vmul.f32 0.00390625, %v112_v53  ;;  %v320_v62 = vadd.f32 %v304_v21, %v1231_v41 }
  0xc3   :  { %v319_v63 = vadd.f32 %v303_v11, %v1233_v42 }
  0xc4   :  { %v230_v47 = vmul.f32 %v1236_v48, %v112_v53  ;;  %v282_v8 = vadd.f32 %v281_v40, %v1236_v48  ;;  %v298_v53 = vmul.f32 %v1211_v20, %v1211_v20 }
  0xc5   :  { %v186_v59 = vpop.xlane.xlu1 %185 }
  0xc6   :  { %v162_v60 = vpop.xlane.xlu0 %161  ;;  %v244_v30 = vsub.f32 %v186_v59, %v228_v12  ;;  %v1247_v59 = vmul.f32 0.00390625, %v1181_v54 }
  0xc7   :  { %v236_v43 = vsub.f32 %v162_v60, %v220_v24 }
  0xc8   :  { %v1250_v60 = vmul.f32 0.003921569, %v244_v30  ;;  %v269_v17 = vadd.f32 %v268_v52, %v1247_v59  ;;  %v222_v28 = vmul.f32 %v1247_v59, %v1181_v54  ;;  %v299_v54 = vmul.f32 %v1247_v59, %v1247_v59 }
  0xc9   :  { %v1194_v3 = vpop.xlane.xlu1 %114  ;;  %v1257_v0 = vmul.f32 0.003921569, %v236_v43 }
  0xca   :  { %v1196_v4 = vpop.xlane.xlu0 %90  ;;  %1684 = vst [vmem:[#allocation12_spill] sm:$0xff] %v1250_v60  ;;  %v1253_v46 = vmul.f32 0.00390625, %v1194_v3  ;;  %v321_v19 = vadd.f32 %v305_v29, %v1250_v60 }
  0xcb   :  { %v1260_v2 = vmul.f32 0.00390625, %v1196_v4  ;;  %v313_v30 = vadd.f32 %v297_v31, %v1257_v0 }
  0xcc   :  { %v283_v21 = vadd.f32 %v282_v8, %v1253_v46 }
  0xcd   :  { %v189_v18 = vpop.xlane.xlu1 %188  ;;  %v270_v40 = vadd.f32 %v269_v17, %v1260_v2  ;;  %v223_v8 = vmul.f32 %v1260_v2, %v1196_v4  ;;  %v308_v17 = vmul.f32 %v1253_v46, %v1253_v46 }
  0xce   :  { %v165_v22 = vpop.xlane.xlu0 %164  ;;  %v245_v61 = vsub.f32 %v189_v18, %v229_v49  ;;  %v307_v18 = vmul.f32 %v1236_v48, %v1236_v48 }
  0xcf   :  { %v237_v10 = vsub.f32 %v165_v22, %v221_v45  ;;  %v340_v22 = vadd.f32 %v320_v62, %v319_v63  ;;  %v231_v45 = vmul.f32 %v1253_v46, %v1194_v3 }
  0xd0   :  { %v1275_v24 = vmul.f32 0.003921569, %v245_v61 }
  0xd1   :  { %v118_v44 = vpop.xlane.xlu1 %117  ;;  %v1283_v49 = vmul.f32 0.003921569, %v237_v10  ;;  %v341_v61 = vadd.f32 %v340_v22, %v321_v19 }
  0xd2   :  { %v1241_v51 = vpop.xlane.xlu0 %93  ;;  %v1265_v12 = vmul.f32 0.00390625, %v118_v44  ;;  %v322_v62 = vadd.f32 %v306_v50, %v1275_v24 }
  0xd3   :  { %v1269_v11 = vmul.f32 0.00390625, %v1241_v51 }
  0xd4   :  { %v284_v29 = vadd.f32 %v283_v21, %v1265_v12  ;;  %v232_v19 = vmul.f32 %v1265_v12, %v118_v44 }
  0xd5   :  { %v192_v7 = vpop.xlane.xlu1 %191  ;;  %v271_v56 = vadd.f32 %v270_v40, %v1269_v11 }
  0xd6   :  { %v168_v14 = vpop.xlane.xlu0 %167  ;;  %v246_v26 = vsub.f32 %v192_v7, %v230_v47  ;;  %v328_v7 = vadd.f32 %v327_v16, %v313_v30  ;;  %v300_v16 = vmul.f32 %v1260_v2, %v1260_v2  ;;  %v342_v30 = vadd.f32 %v341_v61, %v322_v62 }
  0xd7   :  { %v238_v47 = vsub.f32 %v168_v14, %v222_v28  ;;  %v314_v14 = vadd.f32 %v298_v53, %v1283_v49  ;;  %v224_v53 = vmul.f32 %v1269_v11, %v1241_v51 }
  0xd8   :  { %v1294_v63 = vmul.f32 0.003921569, %v246_v26 }
  0xd9   :  { %v121_v43 = vpop.xlane.xlu1 %120  ;;  %v1304_v28 = vmul.f32 0.003921569, %v238_v47 }
  0xda   :  { %v1286_v52 = vmul.f32 0.00390625, %v121_v43  ;;  %v97_v55 = vpop.xlane.xlu0 %96 }
  0xdb   :  { %v1291_v31 = vmul.f32 0.00390625, %v97_v55 }
  0xdc   :  { %v285_v3 = vadd.f32 %v284_v29, %v1286_v52  ;;  %v323_v29 = vadd.f32 %v307_v18, %v1294_v63  ;;  %v233_v38 = vmul.f32 %v1286_v52, %v121_v43  ;;  %v315_v18 = vadd.f32 %v299_v54, %v1304_v28 }
  0xdd   :  { %v272_v10 = vadd.f32 %v271_v56, %v1291_v31  ;;  %v195_v21 = vpop.xlane.xlu1 %194 }
  0xde   :  { %v286_v22 = vrot.slane %v285_v3, 4  ;;  %v247_v50 = vsub.f32 %v195_v21, %v231_v45  ;;  %v171_v26 = vpop.xlane.xlu0 %170  ;;  %v309_v45 = vmul.f32 %v1265_v12, %v1265_v12  ;;  %v329_v21 = vadd.f32 %v328_v7, %v314_v14 }
  0xdf   :  { %v273_v40 = vrot.slane %v272_v10, 4  ;;  %v239_v4 = vsub.f32 %v171_v26, %v223_v8  ;;  %v225_v7 = vmul.f32 %v1291_v31, %v97_v55 }
  0xe0   :  { %v287_v56 = vadd.f32 %v286_v22, %v285_v3  ;;  %v1309_v9 = vmul.f32 0.003921569, %v247_v50  ;;  %v301_v22 = vmul.f32 %v1269_v11, %v1269_v11 }
  0xe1   :  { %v274_v44 = vadd.f32 %v273_v40, %v272_v10  ;;  %v1313_v60 = vmul.f32 0.003921569, %v239_v4  ;;  %v198_v47 = vpop.xlane.xlu1 %197  ;;  %v343_v10 = vadd.f32 %v342_v30, %v323_v29 }
  0xe2   :  { %v288_v8 = vrot.slane %v287_v56, 2  ;;  %v248_v61 = vsub.f32 %v198_v47, %v232_v19  ;;  %v174_v62 = vpop.xlane.xlu0 %173  ;;  %v324_v26 = vadd.f32 %v308_v17, %v1309_v9 }
  0xe3   :  { %v275_v3 = vrot.slane %v274_v44, 2  ;;  %v240_v51 = vsub.f32 %v174_v62, %v224_v53  ;;  %v316_v43 = vadd.f32 %v300_v16, %v1313_v60  ;;  %v310_v53 = vmul.f32 %v1286_v52, %v1286_v52 }
  0xe4   :  { %v289_v50 = vadd.f32 %v288_v8, %v287_v56  ;;  %v1322_v40 = vmul.f32 0.003921569, %v248_v61  ;;  %v330_v56 = vadd.f32 %v329_v21, %v315_v18  ;;  %v381_v62 = vmul.f32 %v1198_v5, %v1185_v57 }
  0xe5   :  { %v276_v14 = vadd.f32 %v275_v3, %v274_v44  ;;  %v1326_v19 = vmul.f32 0.003921569, %v240_v51  ;;  %v201_v4 = vpop.xlane.xlu1 %200  ;;  %v344_v44 = vadd.f32 %v343_v10, %v324_v26  ;;  %v373_v10 = vmul.f32 %v1198_v5, %v1187_v58 }
  0xe6   :  { %v290_v54 = vrot.slane %v289_v50, 1  ;;  %v325_v47 = vadd.f32 %v309_v45, %v1322_v40  ;;  %v249_v30 = vsub.f32 %v201_v4, %v233_v38  ;;  %v177_v29 = vpop.xlane.xlu0 %176  ;;  %v331_v45 = vadd.f32 %v330_v56, %v316_v43 }
  0xe7   :  { %v277_v17 = vrot.slane %v276_v14, 1  ;;  %v317_v8 = vadd.f32 %v301_v22, %v1326_v19  ;;  %v241_v61 = vsub.f32 %v177_v29, %v225_v7  ;;  %v302_v38 = vmul.f32 %v1291_v31, %v1291_v31 }
  0xe8   :  { %v291_v55 = vadd.f32 %v290_v54, %v289_v50  ;;  %v1332_v16 = vmul.f32 0.003921569, %v249_v30  ;;  %v345_v18 = vadd.f32 %v344_v44, %v325_v47  ;;  %v374_v7 = vmul.f32 %v1198_v5, %v1200_v6 }
  0xe9   :  { %v278_v3 = vadd.f32 %v277_v17, %v276_v14  ;;  %v1338_v51 = vmul.f32 0.003921569, %v241_v61  ;;  %v332_v26 = vadd.f32 %v331_v45, %v317_v8  ;;  %v1685_v14 = vstv %s1183_s12 }
  0xea   :  { %v1340_v21 = vmul.f32 0.015625, %v291_v55  ;;  %v326_v22 = vadd.f32 %v310_v53, %v1332_v16  ;;  %v375_v54 = vmul.f32 %v1198_v5, %v1211_v20  ;;  %v383_v47 = vmul.f32 %v1198_v5, %v1208_v15 }
  0xeb   :  { %v293_v50 = vmul.f32 0.015625, %v278_v3  ;;  %v318_v57 = vadd.f32 %v302_v38, %v1338_v51  ;;  %v1686_v53 = vmov %v1685_v14  ;;  %v377_v29 = vmul.f32 %v1198_v5, %v1260_v2 }
  0xec   :  { %v390_v43 = vmul.f32 %v1685_v14, %v1340_v21  ;;  %v346_v4 = vadd.f32 %v345_v18, %v326_v22  ;;  %v376_v56 = vmul.f32 %v1198_v5, %v1247_v59  ;;  %v378_v38 = vmul.f32 %v1198_v5, %v1269_v11 }
  0xed   :  { %v389_v30 = vmul.f32 %v1686_v53, %v293_v50  ;;  %v333_v58 = vadd.f32 %v332_v26, %v318_v57  ;;  %v387_v22 = vmul.f32 %v1198_v5, %v1286_v52 }
  0xee   :  { %v347_v6 = vrot.slane %v346_v4, 4  ;;  %v1361_v17 = vadd.f32 %v390_v43, %v381_v62  ;;  %v1364_v8 = vadd.f32 %v390_v43, %v1205_v13  ;;  %v1366_v61 = vadd.f32 %v390_v43, %v383_v47 }
  0xef   :  { %v334_v20 = vrot.slane %v333_v58, 4  ;;  %v1368_v55 = vadd.f32 %v389_v30, %v373_v10  ;;  %v1371_v15 = vadd.f32 %v389_v30, %v1216_v23  ;;  %v1373_v44 = vadd.f32 %v389_v30, %v375_v54 }
  0xf0   :  { %v348_v2 = vadd.f32 %v347_v6, %v346_v4  ;;  %v1375_v3 = vadd.f32 %v389_v30, %v374_v7  ;;  %v1377_v59 = vadd.f32 %v389_v30, %v377_v29  ;;  %v1379_v62 = vadd.f32 %v389_v30, %v376_v56 }
  0xf1   :  { %v335_v45 = vadd.f32 %v334_v20, %v333_v58  ;;  %v379_v13 = vmul.f32 %v1198_v5, %v1291_v31  ;;  %v382_v23 = vmul.f32 %v1198_v5, %v1191_v1  ;;  %v1391_v57 = vadd.f32 %v389_v30, %v378_v38 }
  0xf2   :  { %v349_v18 = vrot.slane %v348_v2, 2  ;;  %v385_v7 = vmul.f32 %v1198_v5, %v1253_v46  ;;  %v384_v1 = vmul.f32 %v1198_v5, %v1236_v48  ;;  %v386_v4 = vmul.f32 %v1198_v5, %v1265_v12 }
  0xf3   :  { %v336_v10 = vrot.slane %v335_v45, 2  ;;  %v1389_v26 = vadd.f32 %v389_v30, %v379_v13  ;;  %v1397_v31 = vadd.f32 %v390_v43, %v382_v23  ;;  %v1407_v47 = vadd.f32 %v390_v43, %v387_v22 }
  0xf4   :  { %v350_v11 = vadd.f32 %v349_v18, %v348_v2  ;;  %v1401_v52 = vadd.f32 %v390_v43, %v385_v7  ;;  %v1405_v54 = vadd.f32 %v390_v43, %v384_v1  ;;  %v1409_v53 = vadd.f32 %v390_v43, %v386_v4 }
  0xf5   :  { %v337_v14 = vadd.f32 %v336_v10, %v335_v45  ;;  %v355_v29 = vmul.f32 %v293_v50, %v293_v50  ;;  %v1411_v6 = vstv %s958_s13  ;;  %v440_v48 = vstv %s1395_s14 }
  0xf6   :  { %v351_v30 = vrot.slane %v350_v11, 1  ;;  %v425_v45 = vmul.f32 %v1411_v6, %v1219_v25  ;;  %v427_v12 = vmul.f32 %v1411_v6, %v1283_v49  ;;  %v424_v43 = vmul.f32 %v1411_v6, %v1223_v27  ;;  %v1427_v49 = vpop.permute.xlu1 %501 }
  0xf7   :  { %v338_v46 = vrot.slane %v337_v14, 1  ;;  %v356_v50 = vmul.f32 %v1340_v21, %v1340_v21  ;;  %v426_v23 = vmul.f32 %v1411_v6, %v1257_v0  ;;  %v429_v25 = vmul.f32 %v1411_v6, %v1313_v60 }
  0xf8   :  { %v352_v20 = vadd.f32 %v351_v30, %v350_v11  ;;  %v431_v27 = vmul.f32 %v1411_v6, %v1338_v51  ;;  %v428_v0 = vmul.f32 %v1411_v6, %v1304_v28  ;;  %v433_v30 = vmul.f32 %v1411_v6, %v1231_v41 }
  0xf9   :  { %v339_v58 = vadd.f32 %v338_v46, %v337_v14 }
  0xfa   :  { %v354_v13 = vmul.f32 0.015625, %v352_v20  ;;  %v435_v20 = vmul.f32 %v1411_v6, %v1275_v24  ;;  %v1687_v24 = vld [vmem:[#allocation11_spill] sm:$0xff] }
  0xfb   :  { %v353_v56 = vmul.f32 0.015625, %v339_v58 }
  0xfc   :  { %v358_v10 = vsub.f32 %v354_v13, %v356_v50 }
  0xfd   :  { %v357_v2 = vsub.f32 %v353_v56, %v355_v29  ;;  %v1441_v29 = vpop.permute.xlu1 %503  ;;  %v430_v56 = vmul.f32 %v1411_v6, %v1326_v19 }
  0xfe   :  { %v1434_v14 = vmul.f32 %v440_v48, %v358_v10 }
  0xff   :  { %v441_v5 = vmul.f32 %v440_v48, %v357_v2 }
 0x100   :  { %v452_v48 = vadd.f32 %v1434_v14, %v433_v30  ;;  %v454_v19 = vadd.f32 %v1434_v14, %v435_v20 }
 0x101   :  { %v444_v38 = vadd.f32 %v441_v5, %v425_v45  ;;  %v446_v18 = vadd.f32 %v441_v5, %v427_v12  ;;  %v443_v7 = vadd.f32 %v441_v5, %v424_v43  ;;  %v445_v11 = vadd.f32 %v441_v5, %v426_v23  ;;  %v1454_v13 = vpop.permute.xlu1 %505 }
 0x102   :  { %v448_v1 = vadd.f32 %v441_v5, %v429_v25  ;;  %v450_v4 = vadd.f32 %v441_v5, %v431_v27  ;;  %v447_v58 = vadd.f32 %v441_v5, %v428_v0  ;;  %v449_v2 = vadd.f32 %v441_v5, %v430_v56  ;;  %v1688_v5 = vld [vmem:[#allocation12_spill] sm:$0xff] }
 0x103   :  { %v460_v22 = vadd.f32 %v444_v38, %v1136_v32  ;;  %v462_v21 = vadd.f32 %v446_v18, %v1153_v35  ;;  %v459_v60 = vadd.f32 %v443_v7, %v1147_v34  ;;  %v461_v46 = vadd.f32 %v445_v11, %v1142_v33 }
 0x104   :  { %v464_v51 = vadd.f32 %v448_v1, %v1165_v37  ;;  %v466_v28 = vadd.f32 %v450_v4, %v1177_v39  ;;  %v463_v41 = vadd.f32 %v447_v58, %v1159_v36  ;;  %v432_v45 = vmul.f32 %v1411_v6, %v1233_v42 }
 0x105   :  { %973 = vrsqrt.f32 %v460_v22  ;;  %v468_v12 = vadd.f32 %v452_v48, %v1136_v32  ;;  %v437_v38 = vmul.f32 %v1411_v6, %v1309_v9  ;;  %v465_v50 = vadd.f32 %v449_v2, %v1687_v24  ;;  %v510_v1 = vpop.permute.xlu1 %509 }
 0x106   :  { %975 = vrsqrt.f32 %v462_v21  ;;  %v451_v43 = vadd.f32 %v1434_v14, %v432_v45  ;;  %v434_v23 = vmul.f32 %v1411_v6, %v1688_v5  ;;  %v470_v22 = vadd.f32 %v454_v19, %v1153_v35  ;;  %v500_v21 = vpop.permute.xlu0 %499 }
 0x107   :  { %977 = vrsqrt.f32 %v459_v60  ;;  %v456_v25 = vadd.f32 %v1434_v14, %v437_v38  ;;  %v439_v9 = vmul.f32 %v1411_v6, %v1332_v16  ;;  %v436_v27 = vmul.f32 %v1411_v6, %v1294_v63 }
 0x108   :  { %979 = vrsqrt.f32 %v461_v46  ;;  %v453_v10 = vadd.f32 %v1434_v14, %v434_v23  ;;  %v467_v7 = vadd.f32 %v451_v43, %v1147_v34  ;;  %v438_v56 = vmul.f32 %v1411_v6, %v1322_v40 }
 0x109   :  { %981 = vrsqrt.f32 %v464_v51  ;;  %v458_v0 = vadd.f32 %v1434_v14, %v439_v9  ;;  %v472_v4 = vadd.f32 %v456_v25, %v1165_v37  ;;  %v455_v58 = vadd.f32 %v1434_v14, %v436_v27  ;;  %v514_v2 = vpop.permute.xlu1 %513 }
 0x10a   :  { %983 = vrsqrt.f32 %v466_v28  ;;  %v469_v30 = vadd.f32 %v453_v10, %v1142_v33  ;;  %v457_v19 = vadd.f32 %v1434_v14, %v438_v56  ;;  %v407_v56 = vadd.f32 %v1371_v15, %v1147_v34 }
 0x10b   :  { %985 = vrsqrt.f32 %v463_v41  ;;  %v474_v28 = vadd.f32 %v458_v0, %v1177_v39  ;;  %v508_v41 = vpop.permute.xlu0 %507  ;;  %v414_v15 = vadd.f32 %v1389_v26, %v1177_v39  ;;  %v413_v26 = vadd.f32 %v1391_v57, %v1687_v24 }
 0x10c   :  { %987 = vrsqrt.f32 %v468_v12  ;;  %v471_v12 = vadd.f32 %v455_v58, %v1159_v36  ;;  %v410_v58 = vadd.f32 %v1373_v44, %v1153_v35  ;;  %v420_v57 = vadd.f32 %v1401_v52, %v1165_v37 }
 0x10d   :  { %989 = vrsqrt.f32 %v465_v50  ;;  %v473_v50 = vadd.f32 %v457_v19, %v1687_v24  ;;  %v419_v52 = vadd.f32 %v1405_v54, %v1159_v36  ;;  %v1102_v54 = vmov 1  }
 0x10e   :  { %991 = vrsqrt.f32 %v470_v22 }
 0x10f   :  { %993 = vrsqrt.f32 %v467_v7  ;;  %v512_v14 = vpop.permute.xlu0 %511 }
 0x110   :  { %995 = vrsqrt.f32 %v472_v4 }
 0x111   :  { %997 = vrsqrt.f32 %v469_v30 }
 0x112   :  { %v974_v18 = vpop.eup %973  ;;  %999 = vrsqrt.f32 %v474_v28 }
 0x113   :  { %v1463_v42 = vmul.f32 %v974_v18, %v1427_v49  ;;  %v976_v11 = vpop.eup %975  ;;  %1001 = vrsqrt.f32 %v471_v12 }
 0x114   :  { %v1477_v16 = vmul.f32 %v976_v11, %v1454_v13  ;;  %v978_v60 = vpop.eup %977  ;;  %1003 = vrsqrt.f32 %v473_v50 }
 0x115   :  { %557 = vrot.lane.b32.xlu1 %v1463_v42, %s1101_s15  ;;  %v980_v46 = vpop.eup %979  ;;  %v523_v51 = vmul.f32 %v978_v60, %v500_v21  ;;  %v408_v60 = vadd.f32 %v1368_v55, %v1136_v32 }
 0x116   :  { %v982_v63 = vpop.eup %981  ;;  %v525_v45 = vmul.f32 %v980_v46, %v1441_v29 }
 0x117   :  { %v1487_v48 = vmul.f32 %v982_v63, %v510_v1  ;;  %555 = vrot.lane.b32.xlu0 %v523_v51, %s1101_s15  ;;  %v984_v20 = vpop.eup %983 }
 0x118   :  { %v986_v40 = vpop.eup %985  ;;  %v1495_v6 = vmul.f32 %v984_v20, %v514_v2 }
 0x119   :  { %561 = vrot.lane.b32.xlu1 %v1477_v16, %s1101_s15  ;;  %v988_v38 = vpop.eup %987  ;;  %v1498_v43 = vmul.f32 %v986_v40, %v508_v41 }
 0x11a   :  { %v990_v18 = vpop.eup %989  ;;  %v1504_v5 = vmul.f32 %v988_v38, %v1427_v49 }
 0x11b   :  { %559 = vrot.lane.b32.xlu0 %v525_v45, %s1101_s15  ;;  %v992_v23 = vpop.eup %991  ;;  %v1508_v22 = vmul.f32 %v990_v18, %v512_v14 }
 0x11c   :  { %v994_v25 = vpop.eup %993  ;;  %v1513_v9 = vmul.f32 %v992_v23, %v1454_v13 }
 0x11d   :  { %565 = vrot.lane.b32.xlu1 %v1487_v48, %s1101_s15  ;;  %v996_v10 = vpop.eup %995  ;;  %v1517_v49 = vmul.f32 %v994_v25, %v500_v21 }
 0x11e   :  { %v998_v7 = vpop.eup %997  ;;  %v1521_v11 = vmul.f32 %v996_v10, %v510_v1 }
 0x11f   :  { %563 = vrot.lane.b32.xlu0 %v1498_v43, %s1101_s15  ;;  %v1000_v27 = vpop.eup %999  ;;  %v1526_v0 = vmul.f32 %v998_v7, %v1441_v29 }
 0x120   :  { %v1002_v13 = vpop.eup %1001  ;;  %v1530_v4 = vmul.f32 %v1000_v27, %v514_v2 }
 0x121   :  { %569 = vrot.lane.b32.xlu1 %v1495_v6, %s1101_s15  ;;  %v1534_v21 = vmul.f32 %v1002_v13, %v508_v41  ;;  %v1004_v1 = vpop.eup %1003  ;;  %v409_v41 = vadd.f32 %v1375_v3, %v1142_v33  ;;  %v416_v3 = vadd.f32 %v1361_v17, %v1136_v32  ;;  %v415_v17 = vadd.f32 %v1364_v8, %v1147_v34 }
 0x122   :  { %v1540_v29 = vmul.f32 %v1004_v1, %v512_v14  ;;  %v422_v8 = vadd.f32 %v1407_v47, %v1177_v39 }
 0x123   :  { %567 = vrot.lane.b32.xlu0 %v1508_v22, %s1101_s15 }
 0x125   :  { %573 = vrot.lane.b32.xlu1 %v1504_v5, %s1101_s15 }
 0x127   :  { %571 = vrot.lane.b32.xlu0 %v1517_v49, %s1101_s15 }
 0x129   :  { %577 = vrot.lane.b32.xlu1 %v1513_v9, %s1101_s15 }
 0x12b   :  { %575 = vrot.lane.b32.xlu0 %v1526_v0, %s1101_s15 }
 0x12d   :  { %581 = vrot.lane.b32.xlu1 %v1521_v11, %s1101_s15 }
 0x12f   :  { %579 = vrot.lane.b32.xlu0 %v1534_v21, %s1101_s15 }
 0x131   :  { %585 = vrot.lane.b32.xlu1 %v1530_v4, %s1101_s15 }
 0x133   :  { %583 = vrot.lane.b32.xlu0 %v1540_v29, %s1101_s15 }
 0x135   :  { %704 = vperm.xlu1 %970, %v1463_v42  }
 0x137   :  { %700 = vperm.xlu0 %969, %v523_v51   ;;  %v412_v51 = vadd.f32 %v1377_v59, %v1165_v37  ;;  %v411_v59 = vadd.f32 %v1379_v62, %v1159_v36  ;;  %v418_v62 = vadd.f32 %v1366_v61, %v1153_v35  ;;  %v417_v61 = vadd.f32 %v1397_v31, %v1142_v33 }
 0x138   :  { %v421_v31 = vadd.f32 %v1409_v53, %v1687_v24 }
 0x139   :  { %708 = vperm.xlu1 %970, %v525_v45  }
 0x187   :  { %v558_v46 = vpop.permute.xlu1 %557 }
 0x188   :  { %v604_v30 = vmul.f32 %v558_v46, %v408_v60 }
 0x189   :  { %v556_v28 = vpop.permute.xlu0 %555 }
 0x18a   :  { %637 = vrot.lane.b32.xlu1 %v604_v30, %s1101_s15  ;;  %v603_v20 = vmul.f32 %v556_v28, %v407_v56 }
 0x18b   :  { %v562_v63 = vpop.permute.xlu1 %561 }
 0x18c   :  { %v606_v42 = vmul.f32 %v562_v63, %v410_v58  ;;  %635 = vrot.lane.b32.xlu0 %v603_v20, %s1101_s15 }
 0x18d   :  { %v560_v44 = vpop.permute.xlu0 %559 }
 0x18e   :  { %641 = vrot.lane.b32.xlu1 %v606_v42, %s1101_s15  ;;  %v605_v45 = vmul.f32 %v560_v44, %v409_v41 }
 0x18f   :  { %v566_v55 = vpop.permute.xlu1 %565 }
 0x190   :  { %v608_v2 = vmul.f32 %v566_v55, %v412_v51  ;;  %639 = vrot.lane.b32.xlu0 %v605_v45, %s1101_s15 }
 0x191   :  { %v564_v40 = vpop.permute.xlu0 %563 }
 0x192   :  { %645 = vrot.lane.b32.xlu1 %v608_v2, %s1101_s15  ;;  %v607_v38 = vmul.f32 %v564_v40, %v411_v59 }
 0x193   :  { %v570_v12 = vpop.permute.xlu1 %569 }
 0x194   :  { %v610_v19 = vmul.f32 %v570_v12, %v414_v15  ;;  %643 = vrot.lane.b32.xlu0 %v607_v38, %s1101_s15 }
 0x195   :  { %v568_v14 = vpop.permute.xlu0 %567 }
 0x196   :  { %649 = vrot.lane.b32.xlu1 %v610_v19, %s1101_s15  ;;  %v609_v23 = vmul.f32 %v568_v14, %v413_v26 }
 0x197   :  { %v574_v50 = vpop.permute.xlu1 %573 }
 0x198   :  { %v612_v18 = vmul.f32 %v574_v50, %v416_v3  ;;  %647 = vrot.lane.b32.xlu0 %v609_v23, %s1101_s15 }
 0x199   :  { %v572_v7 = vpop.permute.xlu0 %571 }
 0x19a   :  { %653 = vrot.lane.b32.xlu1 %v612_v18, %s1101_s15  ;;  %v611_v27 = vmul.f32 %v572_v7, %v415_v17 }
 0x19b   :  { %v578_v25 = vpop.permute.xlu1 %577 }
 0x19c   :  { %v614_v10 = vmul.f32 %v578_v25, %v418_v62  ;;  %651 = vrot.lane.b32.xlu0 %v611_v27, %s1101_s15  ;;  %v1005_v27 = vld [vmem:[#allocation6 + $0x10] sm:$0xff] }
 0x19d   :  { %v576_v60 = vpop.permute.xlu0 %575 }
 0x19e   :  { %657 = vrot.lane.b32.xlu1 %v614_v10, %s1101_s15  ;;  %v613_v46 = vmul.f32 %v576_v60, %v417_v61 }
 0x19f   :  { %v582_v13 = vpop.permute.xlu1 %581 }
 0x1a0   :  { %v616_v1 = vmul.f32 %v582_v13, %v420_v57  ;;  %655 = vrot.lane.b32.xlu0 %v613_v46, %s1101_s15  ;;  %v1006_v13 = vld [vmem:[#allocation6 + $0x18] sm:$0xff] }
 0x1a1   :  { %v580_v63 = vpop.permute.xlu0 %579 }
 0x1a2   :  { %661 = vrot.lane.b32.xlu1 %v616_v1, %s1101_s15  ;;  %v615_v56 = vmul.f32 %v580_v63, %v419_v52 }
 0x1a3   :  { %v586_v30 = vpop.permute.xlu1 %585 }
 0x1a4   :  { %v618_v58 = vmul.f32 %v586_v30, %v422_v8  ;;  %659 = vrot.lane.b32.xlu0 %v615_v56, %s1101_s15  ;;  %v1007_v30 = vld [vmem:[#allocation6] sm:$0xff] }
 0x1a5   :  { %v584_v42 = vpop.permute.xlu0 %583 }
 0x1a6   :  { %665 = vrot.lane.b32.xlu1 %v618_v58, %s1101_s15  ;;  %v617_v28 = vmul.f32 %v584_v42, %v421_v31  ;;  %v1008_v58 = vld [vmem:[#allocation6 + $0x8] sm:$0xff] }
 0x1a8   :  { %663 = vrot.lane.b32.xlu0 %v617_v28, %s1101_s15  ;;  %v1009_v28 = vld [vmem:[#allocation6 + $0x20] sm:$0xff] }
 0x1aa   :  { %716 = vperm.xlu1 %970, %v1498_v43  }
 0x1ac   :  { %712 = vperm.xlu0 %969, %v1477_v16  }
 0x1ae   :  { %724 = vperm.xlu1 %970, %v1508_v22  }
 0x1b0   :  { %720 = vperm.xlu0 %969, %v1487_v48   ;;  %v1606_v47 = vpop.permute.xlu1 %704 }
 0x1b1   :  { %v765_v57 = vmul.f32 %v1005_v27, %v1606_v47  ;;  %v766_v61 = vmul.f32 %v1006_v13, %v1606_v47  ;;  %v1010_v47 = vld [vmem:[#allocation6 + $0x28] sm:$0xff] }
 0x1b2   :  { %732 = vperm.xlu1 %970, %v1517_v49  }
 0x1b4   :  { %728 = vperm.xlu0 %969, %v1495_v6   ;;  %v1608_v53 = vpop.permute.xlu1 %708  ;;  %v1611_v6 = vpop.permute.xlu0 %700 }
 0x1b5   :  { %v763_v52 = vmul.f32 %v1007_v30, %v1611_v6  ;;  %v764_v63 = vmul.f32 %v1008_v58, %v1611_v6 }
 0x1b6   :  { %740 = vperm.xlu1 %970, %v1526_v0  }
 0x1b8   :  { %736 = vperm.xlu0 %969, %v1504_v5  }
 0x1ba   :  { %748 = vperm.xlu1 %970, %v1534_v21  }
 0x1bc   :  { %744 = vperm.xlu0 %969, %v1513_v9  }
 0x1be   :  { %756 = vperm.xlu1 %970, %v1540_v29  }
 0x1c0   :  { %752 = vperm.xlu0 %969, %v1521_v11  }
 0x1c2   :  { %971 = vset.pattern.permute.xlu1 %v1102_v54 }
 0x1c4   :  { %760 = vperm.xlu0 %969, %v1530_v4  }
 0x1c8   :  { %972 = vset.pattern.permute.xlu0 %v1102_v54  ;;  %v767_v54 = vmul.f32 %v1009_v28, %v1608_v53 }
 0x1fc   :  { %v638_v16 = vpop.permute.xlu1 %637 }
 0x1fd   :  { %v684_v48 = vsub.f32 %v1136_v32, %v638_v16  ;;  %v768_v16 = vmul.f32 %v1010_v47, %v1608_v53 }
 0x1fe   :  { %v636_v5 = vpop.permute.xlu0 %635 }
 0x1ff   :  { %802 = vperm.xlu0 %972, %v684_v48   ;;  %v683_v22 = vsub.f32 %v1147_v34, %v636_v5 }
 0x200   :  { %v642_v43 = vpop.permute.xlu1 %641 }
 0x201   :  { %797 = vperm.xlu1 %971, %v683_v22   ;;  %v686_v21 = vsub.f32 %v1153_v35, %v642_v43  ;;  %v1011_v22 = vld [vmem:[#allocation6 + $0x40] sm:$0xff] }
 0x202   :  { %v640_v49 = vpop.permute.xlu0 %639 }
 0x203   :  { %v685_v11 = vsub.f32 %v1142_v33, %v640_v49  ;;  %v1012_v49 = vld [vmem:[#allocation6 + $0x48] sm:$0xff] }
 0x204   :  { %v646_v9 = vpop.permute.xlu1 %645 }
 0x205   :  { %807 = vperm.xlu1 %971, %v685_v11   ;;  %v688_v55 = vsub.f32 %v1165_v37, %v646_v9 }
 0x206   :  { %v644_v4 = vpop.permute.xlu0 %643 }
 0x207   :  { %v687_v29 = vsub.f32 %v1159_v36, %v644_v4  ;;  %v1014_v4 = vld [vmem:[#allocation6 + $0x38] sm:$0xff] }
 0x208   :  { %v650_v0 = vpop.permute.xlu1 %649 }
 0x209   :  { %812 = vperm.xlu1 %971, %v686_v21   ;;  %817 = vperm.xlu0 %972, %v687_v29   ;;  %v690_v44 = vsub.f32 %v1177_v39, %v650_v0  ;;  %v1013_v0 = vld [vmem:[#allocation6 + $0x30] sm:$0xff] }
 0x20a   :  { %v648_v20 = vpop.permute.xlu0 %647 }
 0x20b   :  { %v689_v41 = vsub.f32 %v1687_v24, %v648_v20 }
 0x20c   :  { %v654_v51 = vpop.permute.xlu1 %653 }
 0x20d   :  { %822 = vperm.xlu1 %971, %v688_v55   ;;  %827 = vperm.xlu0 %972, %v689_v41   ;;  %v692_v59 = vsub.f32 %v1136_v32, %v654_v51 }
 0x20e   :  { %v652_v2 = vpop.permute.xlu0 %651 }
 0x20f   :  { %v691_v45 = vsub.f32 %v1147_v34, %v652_v2  ;;  %v1015_v2 = vld [vmem:[#allocation6 + $0x60] sm:$0xff] }
 0x210   :  { %v658_v15 = vpop.permute.xlu1 %657 }
 0x211   :  { %832 = vperm.xlu1 %971, %v690_v44   ;;  %837 = vperm.xlu0 %972, %v691_v45   ;;  %v694_v3 = vsub.f32 %v1153_v35, %v658_v15  ;;  %v1016_v45 = vld [vmem:[#allocation6 + $0x68] sm:$0xff] }
 0x212   :  { %v656_v12 = vpop.permute.xlu0 %655 }
 0x213   :  { %v693_v19 = vsub.f32 %v1142_v33, %v656_v12  ;;  %v1017_v12 = vld [vmem:[#allocation6 + $0x50] sm:$0xff] }
 0x214   :  { %v662_v40 = vpop.permute.xlu1 %661 }
 0x215   :  { %842 = vperm.xlu1 %971, %v692_v59   ;;  %847 = vperm.xlu0 %972, %v693_v19   ;;  %v696_v34 = vsub.f32 %v1165_v37, %v662_v40  ;;  %v1018_v19 = vld [vmem:[#allocation6 + $0x58] sm:$0xff] }
 0x216   :  { %v660_v38 = vpop.permute.xlu0 %659 }
 0x217   :  { %v695_v50 = vsub.f32 %v1159_v36, %v660_v38 }
 0x218   :  { %v666_v14 = vpop.permute.xlu1 %665 }
 0x219   :  { %852 = vperm.xlu1 %971, %v694_v3   ;;  %857 = vperm.xlu0 %972, %v695_v50   ;;  %v698_v32 = vsub.f32 %v1177_v39, %v666_v14  ;;  %v1019_v14 = vld [vmem:[#allocation6 + $0x80] sm:$0xff] }
 0x21a   :  { %v664_v26 = vpop.permute.xlu0 %663 }
 0x21b   :  { %v697_v18 = vsub.f32 %v1687_v24, %v664_v26 }
 0x21d   :  { %862 = vperm.xlu1 %971, %v696_v34   ;;  %867 = vperm.xlu0 %972, %v697_v18  }
 0x221   :  { %872 = vperm.xlu1 %971, %v698_v32  }
 0x225   :  { %v717_v62 = vpop.permute.xlu1 %716 }
 0x226   :  { %v771_v9 = vmul.f32 %v1011_v22, %v717_v62  ;;  %v772_v11 = vmul.f32 %v1012_v49, %v717_v62  ;;  %v1029_v49 = vld [vmem:[#allocation6 + $0xb0] sm:$0xff] }
 0x227   :  { %v713_v33 = vpop.permute.xlu0 %712 }
 0x228   :  { %v769_v6 = vmul.f32 %v1013_v0, %v713_v33  ;;  %v770_v21 = vmul.f32 %v1014_v4, %v713_v33  ;;  %v1020_v33 = vld [vmem:[#allocation6 + $0x88] sm:$0xff] }
 0x229   :  { %v725_v35 = vpop.permute.xlu1 %724 }
 0x22a   :  { %v775_v44 = vmul.f32 %v1015_v2, %v725_v35  ;;  %v776_v15 = vmul.f32 %v1016_v45, %v725_v35  ;;  %v1021_v35 = vld [vmem:[#allocation6 + $0x70] sm:$0xff] }
 0x22b   :  { %v721_v23 = vpop.permute.xlu0 %720  ;;  %v1033_v2 = vld [vmem:[#allocation6 + $0xd0] sm:$0xff] }
 0x22c   :  { %v773_v59 = vmul.f32 %v1017_v12, %v721_v23  ;;  %v774_v40 = vmul.f32 %v1018_v19, %v721_v23  ;;  %v1022_v23 = vld [vmem:[#allocation6 + $0x78] sm:$0xff] }
 0x22d   :  { %v1632_v17 = vpop.permute.xlu1 %732 }
 0x22e   :  { %v779_v32 = vmul.f32 %v1019_v14, %v1632_v17  ;;  %v780_v62 = vmul.f32 %v1020_v33, %v1632_v17  ;;  %v1024_v17 = vld [vmem:[#allocation6 + $0xa8] sm:$0xff] }
 0x22f   :  { %v1628_v25 = vpop.permute.xlu0 %728 }
 0x230   :  { %v777_v27 = vmul.f32 %v1021_v35, %v1628_v25 }
 0x231   :  { %v1636_v37 = vpop.permute.xlu1 %740 }
 0x233   :  { %v1630_v36 = vpop.permute.xlu0 %736 }
 0x235   :  { %v1640_v7 = vpop.permute.xlu1 %748 }
 0x237   :  { %v1634_v10 = vpop.permute.xlu0 %744 }
 0x239   :  { %v1646_v8 = vpop.permute.xlu1 %756 }
 0x23b   :  { %v1638_v24 = vpop.permute.xlu0 %752 }
 0x23f   :  { %v1642_v39 = vpop.permute.xlu0 %760 }
 0x27a   :  { %v803_v1 = vpop.permute.xlu0 %802 }
 0x27b   :  { %v877_v60 = vadd.f32 %v803_v1, %v765_v57  ;;  %v878_v46 = vadd.f32 %v803_v1, %v766_v61  ;;  %v778_v57 = vmul.f32 %v1022_v23, %v1628_v25  ;;  %v1026_v25 = vld [vmem:[#allocation6 + $0x98] sm:$0xff] }
 0x27c   :  { %v798_v56 = vpop.permute.xlu1 %797 }
 0x27d   :  { %909 = vst [vmem:[#allocation7 + $0x10] sm:$0xff] %v877_v60  ;;  %910 = vst [vmem:[#allocation7 + $0x18] sm:$0xff] %v878_v46  ;;  %v875_v31 = vadd.f32 %v798_v56, %v763_v52  ;;  %v876_v42 = vadd.f32 %v798_v56, %v764_v63  ;;  %v1023_v52 = vld [vmem:[#allocation6 + $0xa0] sm:$0xff]  ;;  %v784_v63 = vmul.f32 %v1024_v17, %v1636_v37  ;;  %v1025_v56 = vld [vmem:[#allocation6 + $0x90] sm:$0xff] }
 0x27e   :  { %v783_v58 = vmul.f32 %v1023_v52, %v1636_v37  ;;  %v1028_v37 = vld [vmem:[#allocation6 + $0xc8] sm:$0xff] }
 0x27f   :  { %907 = vst [vmem:[#allocation7] sm:$0xff] %v875_v31  ;;  %908 = vst [vmem:[#allocation7 + $0x8] sm:$0xff] %v876_v42  ;;  %v781_v31 = vmul.f32 %v1025_v56, %v1630_v36  ;;  %v782_v42 = vmul.f32 %v1026_v25, %v1630_v36  ;;  %v1030_v36 = vld [vmem:[#allocation6 + $0xb8] sm:$0xff] }
 0x280   :  { %v808_v48 = vpop.permute.xlu1 %807  ;;  %v786_v0 = vmul.f32 %v1030_v36, %v1634_v10 }
 0x281   :  { %v879_v43 = vadd.f32 %v808_v48, %v767_v54  ;;  %v880_v5 = vadd.f32 %v808_v48, %v768_v16 }
 0x283   :  { %911 = vst [vmem:[#allocation7 + $0x20] sm:$0xff] %v879_v43  ;;  %912 = vst [vmem:[#allocation7 + $0x28] sm:$0xff] %v880_v5  ;;  %v1027_v5 = vld [vmem:[#allocation6 + $0xc0] sm:$0xff] }
 0x284   :  { %v813_v29 = vpop.permute.xlu1 %812  ;;  %v818_v20 = vpop.permute.xlu0 %817  ;;  %v787_v22 = vmul.f32 %v1027_v5, %v1640_v7 }
 0x285   :  { %v881_v51 = vadd.f32 %v813_v29, %v769_v6  ;;  %v882_v55 = vadd.f32 %v813_v29, %v770_v21  ;;  %v883_v53 = vadd.f32 %v818_v20, %v771_v9  ;;  %v884_v41 = vadd.f32 %v818_v20, %v772_v11 }
 0x286   :  { %v788_v9 = vmul.f32 %v1028_v37, %v1640_v7  ;;  %v785_v11 = vmul.f32 %v1029_v49, %v1634_v10  ;;  %v1032_v7 = vld [vmem:[#allocation6 + $0xe8] sm:$0xff]  ;;  %v1034_v10 = vld [vmem:[#allocation6 + $0xd8] sm:$0xff] }
 0x287   :  { %913 = vst [vmem:[#allocation7 + $0x30] sm:$0xff] %v881_v51  ;;  %914 = vst [vmem:[#allocation7 + $0x38] sm:$0xff] %v882_v55  ;;  %v1031_v55 = vld [vmem:[#allocation6 + $0xe0] sm:$0xff]  ;;  %v790_v45 = vmul.f32 %v1034_v10, %v1638_v24 }
 0x288   :  { %915 = vst [vmem:[#allocation7 + $0x40] sm:$0xff] %v883_v53  ;;  %916 = vst [vmem:[#allocation7 + $0x48] sm:$0xff] %v884_v41  ;;  %v823_v38 = vpop.permute.xlu1 %822  ;;  %v828_v3 = vpop.permute.xlu0 %827  ;;  %v791_v53 = vmul.f32 %v1031_v55, %v1646_v8  ;;  %v792_v41 = vmul.f32 %v1032_v7, %v1646_v8 }
 0x289   :  { %v885_v50 = vadd.f32 %v823_v38, %v773_v59  ;;  %v886_v26 = vadd.f32 %v823_v38, %v774_v40  ;;  %v887_v34 = vadd.f32 %v828_v3, %v775_v44  ;;  %v888_v18 = vadd.f32 %v828_v3, %v776_v15  ;;  %v1035_v3 = vld [vmem:[#allocation6 + $0xf0] sm:$0xff] }
 0x28a   :  { %v789_v44 = vmul.f32 %v1033_v2, %v1638_v24  ;;  %v793_v8 = vmul.f32 %v1035_v3, %v1642_v39 }
 0x28b   :  { %917 = vst [vmem:[#allocation7 + $0x50] sm:$0xff] %v885_v50  ;;  %918 = vst [vmem:[#allocation7 + $0x58] sm:$0xff] %v886_v26  ;;  %v1036_v50 = vld [vmem:[#allocation6 + $0xf8] sm:$0xff] }
 0x28c   :  { %919 = vst [vmem:[#allocation7 + $0x60] sm:$0xff] %v887_v34  ;;  %920 = vst [vmem:[#allocation7 + $0x68] sm:$0xff] %v888_v18  ;;  %v833_v13 = vpop.permute.xlu1 %832  ;;  %v838_v61 = vpop.permute.xlu0 %837  ;;  %v794_v26 = vmul.f32 %v1036_v50, %v1642_v39 }
 0x28d   :  { %v889_v1 = vadd.f32 %v833_v13, %v777_v27  ;;  %v890_v60 = vadd.f32 %v833_v13, %v778_v57  ;;  %v891_v46 = vadd.f32 %v838_v61, %v779_v32  ;;  %v892_v30 = vadd.f32 %v838_v61, %v780_v62 }
 0x28f   :  { %921 = vst [vmem:[#allocation7 + $0x70] sm:$0xff] %v889_v1  ;;  %922 = vst [vmem:[#allocation7 + $0x78] sm:$0xff] %v890_v60 }
 0x290   :  { %923 = vst [vmem:[#allocation7 + $0x80] sm:$0xff] %v891_v46  ;;  %924 = vst [vmem:[#allocation7 + $0x88] sm:$0xff] %v892_v30  ;;  %v843_v28 = vpop.permute.xlu1 %842  ;;  %v848_v54 = vpop.permute.xlu0 %847 }
 0x291   :  { %v893_v47 = vadd.f32 %v843_v28, %v781_v31  ;;  %v894_v16 = vadd.f32 %v843_v28, %v782_v42  ;;  %v895_v48 = vadd.f32 %v848_v54, %v783_v58  ;;  %v896_v43 = vadd.f32 %v848_v54, %v784_v63 }
 0x293   :  { %925 = vst [vmem:[#allocation7 + $0x90] sm:$0xff] %v893_v47  ;;  %926 = vst [vmem:[#allocation7 + $0x98] sm:$0xff] %v894_v16 }
 0x294   :  { %927 = vst [vmem:[#allocation7 + $0xa0] sm:$0xff] %v895_v48  ;;  %928 = vst [vmem:[#allocation7 + $0xa8] sm:$0xff] %v896_v43  ;;  %v853_v6 = vpop.permute.xlu1 %852  ;;  %v858_v4 = vpop.permute.xlu0 %857 }
 0x295   :  { %v897_v21 = vadd.f32 %v853_v6, %v785_v11  ;;  %v898_v29 = vadd.f32 %v853_v6, %v786_v0  ;;  %v899_v20 = vadd.f32 %v858_v4, %v787_v22  ;;  %v900_v51 = vadd.f32 %v858_v4, %v788_v9 }
 0x297   :  { %929 = vst [vmem:[#allocation7 + $0xb0] sm:$0xff] %v897_v21  ;;  %930 = vst [vmem:[#allocation7 + $0xb8] sm:$0xff] %v898_v29 }
 0x298   :  { %931 = vst [vmem:[#allocation7 + $0xc0] sm:$0xff] %v899_v20  ;;  %932 = vst [vmem:[#allocation7 + $0xc8] sm:$0xff] %v900_v51  ;;  %v863_v15 = vpop.permute.xlu1 %862  ;;  %v868_v12 = vpop.permute.xlu0 %867 }
 0x299   :  { %v901_v59 = vadd.f32 %v863_v15, %v789_v44  ;;  %v902_v19 = vadd.f32 %v863_v15, %v790_v45  ;;  %v903_v40 = vadd.f32 %v868_v12, %v791_v53  ;;  %v904_v38 = vadd.f32 %v868_v12, %v792_v41 }
 0x29b   :  { %933 = vst [vmem:[#allocation7 + $0xd0] sm:$0xff] %v901_v59  ;;  %934 = vst [vmem:[#allocation7 + $0xd8] sm:$0xff] %v902_v19 }
 0x29c   :  { %935 = vst [vmem:[#allocation7 + $0xe0] sm:$0xff] %v903_v40  ;;  %936 = vst [vmem:[#allocation7 + $0xe8] sm:$0xff] %v904_v38  ;;  %v873_v24 = vpop.permute.xlu1 %872 }
 0x29d   :  { %v905_v34 = vadd.f32 %v873_v24, %v793_v8  ;;  %v906_v18 = vadd.f32 %v873_v24, %v794_v26 }
 0x29f   :  { %937 = vst [vmem:[#allocation7 + $0xf0] sm:$0xff] %v905_v34  ;;  %938 = vst [vmem:[#allocation7 + $0xf8] sm:$0xff] %v906_v18 }
 0x2a0   :  { %1080 = shalt.err (!%p1077_p0)
}
 0x2a1   :  { %950 = dma.vmem_to_hbm [thread:$0]  %s945_s17, 4096, %s1679_s3, [#allocation4], %s1097_s0, %s1097_s0, %s1098_s20  }
 0x2a2   :  { %1093 = dma.done.wait [#allocation4], 4096  }
 0x2a3   :  { %1094 = vsyncadd [#allocation4], 4294963200 }
 0x2a4   :  { %954 = vsyncpa [#allocation3], 1 }
 0x2a5   :  { %955 = vsyncpa [#allocation4], 1 }
 0x2a6   :  { %956 = vsyncpa [#allocation5], 1 }

</bundles_post_ra>
